<compile_context>
chip_gen: v7x
topology: tpu7x:2x2x1
jax: 0.10.0
libtpu: 0.0.40
codegen_flags: <defaults>
</compile_context>

<pallas_src>
import jax
import jax.numpy as jnp
from jax.experimental import pallas as pl
from jax.experimental.pallas import tpu as pltpu


def snn_kernel(xT_ref, w1_ref, b1_ref, w2_ref, b2_ref, w3_ref, b3_ref, o_ref):
    xT = xT_ref[...]                                                 # (8, TB) bf16

    # fc1 + ReLU : (32, 8) @ (8, TB) -> (32, TB), f32 accumulate
    h1 = jnp.dot(w1_ref[...], xT, preferred_element_type=jnp.float32)
    h1 = jnp.maximum(h1 + b1_ref[...], 0.0)

    # fc2 + ReLU : (64, 32) @ (32, TB) -> (64, TB)
    h2 = jnp.dot(w2_ref[...], h1.astype(w2_ref.dtype),
                 preferred_element_type=jnp.float32)
    h2 = jnp.maximum(h2 + b2_ref[...], 0.0)

    # dropout: eval-mode => identity
    # TODO(synk): training-mode dropout would use pltpu.prng_seed +
    # pltpu.prng_random_bits to build a Bernoulli mask and scale by 1/(1-p).

    # fc3 : (4, 64) @ (64, TB) -> (4, TB)
    logits = jnp.dot(w3_ref[...], h2.astype(w3_ref.dtype),
                     preferred_element_type=jnp.float32)
    logits = logits + b3_ref[...]                                    # (4, TB)

    # softmax over the class (sublane) axis — numerically stable.
    m = jnp.max(logits, axis=0, keepdims=True)                       # XLU reduce
    e = jnp.exp(logits - m)                                          # EUP
    denom = jnp.sum(e, axis=0, keepdims=True)
    o_ref[...] = (e * pl.reciprocal(denom, approx=True)).astype(o_ref.dtype)


def snn_dropout_forward(x, w1, b1, w2, b2, w3, b3, *, block_b=1024):
    """x: (B, 8) float32. Weights in PyTorch layout (out, in); biases (out, 1)."""
    assert block_b % 128 == 0, "batch tile must stay lane-dense (multiple of 128)"
    B, f_in = x.shape
    n_class = w3.shape[0]
    compute_dtype = jnp.bfloat16

    # Batch tile: lane-dense (multiple of 128) for large B, otherwise the full
    # (small) batch as a single block (full-extent block satisfies tiling rules).
    if B <= block_b:
        TB, B_pad = B, B
    else:
        TB = block_b
        B_pad = pl.cdiv(B, TB) * TB

    # Transposed, padded, bf16 input: (8, B_pad) with batch on lanes.
    # (Wrapper-side transpose/pad is layout plumbing, not hoisted compute.)
    xT = jnp.pad(x, ((0, B_pad - B), (0, 0))).T.astype(compute_dtype)
    w1c = w1.astype(compute_dtype)
    w2c = w2.astype(compute_dtype)
    w3c = w3.astype(compute_dtype)

    flops = 2 * B_pad * (8 * 32 + 32 * 64 + 64 * n_class)
    bytes_accessed = (
        xT.size * 2
        + (w1c.size + w2c.size + w3c.size) * 2
        + (b1.size + b2.size + b3.size) * 4
        + B_pad * n_class * 4
    )

    def resident(arr):  # weights / biases: same block every grid step
        return pl.BlockSpec(arr.shape, lambda i: (0, 0))

    outT = pl.pallas_call(
        snn_kernel,
        out_shape=jax.ShapeDtypeStruct((n_class, B_pad), jnp.float32),
        grid=(B_pad // TB,),
        in_specs=[
            pl.BlockSpec((f_in, TB), lambda i: (0, i)),
            resident(w1c), resident(b1),
            resident(w2c), resident(b2),
            resident(w3c), resident(b3),
        ],
        out_specs=pl.BlockSpec((n_class, TB), lambda i: (0, i)),
        compiler_params=pltpu.CompilerParams(
            dimension_semantics=("parallel",)),
        cost_estimate=pl.CostEstimate(
            flops=flops,
            transcendentals=B_pad * (n_class + 1),
            bytes_accessed=bytes_accessed),
    )(xT, w1c, b1, w2c, b2, w3c, b3)

    return outT.T[:B]                                                # (B, n_class)


def snn_reference(x, w1, b1, w2, b2, w3, b3):
    """Pure-JAX f32 reference (PyTorch forward, eval-mode dropout)."""
    h1 = jnp.maximum(x @ w1.T + b1.T, 0.0)
    h2 = jnp.maximum(h1 @ w2.T + b2.T, 0.0)
    logits = h2 @ w3.T + b3.T
    return jax.nn.softmax(logits, axis=-1)


def init_params(key, n_class=4):
    """Deterministic init matching nn.Linear: weights (out, in), biases (out, 1)."""
    ks = jax.random.split(key, 6)

    def linear(kw, kb, fan_in, fan_out):
        bound = 1.0 / jnp.sqrt(fan_in)
        w = jax.random.uniform(kw, (fan_out, fan_in), jnp.float32, -bound, bound)
        b = jax.random.uniform(kb, (fan_out, 1), jnp.float32, -bound, bound)
        return w, b

    w1, b1 = linear(ks[0], ks[1], 8, 32)
    w2, b2 = linear(ks[2], ks[3], 32, 64)
    w3, b3 = linear(ks[4], ks[5], 64, n_class)
    return w1, b1, w2, b2, w3, b3


if __name__ == "__main__":
    key = jax.random.PRNGKey(0)
    k_x, k_p = jax.random.split(key)

    B = 256                                   # small, but exercises the batch grid
    x = jax.random.normal(k_x, (B, 8), dtype=jnp.float32)
    params = init_params(k_p, n_class=4)

    out = snn_dropout_forward(x, *params, block_b=128)   # grid = (2,)
    out = jax.block_until_ready(out)

    # sanity: shape, softmax rows sum to 1, and match f32 reference (bf16 tol)
    assert out.shape == (B, 4)
    assert jnp.allclose(jnp.sum(out, axis=-1), 1.0, atol=1e-2)
    ref = snn_reference(x, *params)
    assert jnp.allclose(out, ref, atol=5e-2), float(jnp.max(jnp.abs(out - ref)))

    print("KERNEL_OK")
</pallas_src>

<mosaic_0001>
module attributes {stable_mosaic.version = 11 : i64} {
  func.func @snn_kernel(%arg0: i32, %arg1: memref<8x128xbf16, #tpu.memory_space<vmem>>, %arg2: memref<32x8xbf16, #tpu.memory_space<vmem>>, %arg3: memref<32x1xf32, #tpu.memory_space<vmem>>, %arg4: memref<64x32xbf16, #tpu.memory_space<vmem>>, %arg5: memref<64x1xf32, #tpu.memory_space<vmem>>, %arg6: memref<4x64xbf16, #tpu.memory_space<vmem>>, %arg7: memref<4x1xf32, #tpu.memory_space<vmem>>, %arg8: memref<4x128xf32, #tpu.memory_space<vmem>>) attributes {dimension_semantics = [#tpu.dimension_semantics<parallel>], iteration_bounds = array<i64: 2>, scalar_prefetch = 0 : i64, scratch_operands = 0 : i64, tpu.core_type = #tpu.core_type<tc>, window_params = [{transform_indices = @transform_0, window_bounds = array<i64: 8, 128>}, {pipeline_mode = #tpu.pipeline_mode<synchronous>, transform_indices = @transform_1, window_bounds = array<i64: 32, 8>}, {pipeline_mode = #tpu.pipeline_mode<synchronous>, transform_indices = @transform_2, window_bounds = array<i64: 32, 1>}, {pipeline_mode = #tpu.pipeline_mode<synchronous>, transform_indices = @transform_3, window_bounds = array<i64: 64, 32>}, {pipeline_mode = #tpu.pipeline_mode<synchronous>, transform_indices = @transform_4, window_bounds = array<i64: 64, 1>}, {pipeline_mode = #tpu.pipeline_mode<synchronous>, transform_indices = @transform_5, window_bounds = array<i64: 4, 64>}, {pipeline_mode = #tpu.pipeline_mode<synchronous>, transform_indices = @transform_6, window_bounds = array<i64: 4, 1>}, {transform_indices = @transform_7, window_bounds = array<i64: 4, 128>}]} {
    %c0 = arith.constant 0 : index
    %c0_0 = arith.constant 0 : index
    %0 = vector.load %arg1[%c0, %c0_0] : memref<8x128xbf16, #tpu.memory_space<vmem>>, vector<8x128xbf16>
    %c0_1 = arith.constant 0 : index
    %c0_2 = arith.constant 0 : index
    %1 = vector.load %arg2[%c0_1, %c0_2] : memref<32x8xbf16, #tpu.memory_space<vmem>>, vector<32x8xbf16>
    %cst = arith.constant dense<0.000000e+00> : vector<32x128xf32>
    %2 = tpu.matmul %1, %0, %cst {dimension_numbers = #tpu.dot_dimension_numbers<[1], [0], [0], [1], [0, 0, 1, 1], [], []>} : vector<32x8xbf16>, vector<8x128xbf16>, vector<32x128xf32> -> vector<32x128xf32>
    %c0_3 = arith.constant 0 : index
    %c0_4 = arith.constant 0 : index
    %3 = vector.load %arg3[%c0_3, %c0_4] : memref<32x1xf32, #tpu.memory_space<vmem>>, vector<32x1xf32>
    %4 = vector.broadcast %3 : vector<32x1xf32> to vector<32x128xf32>
    %5 = arith.addf %2, %4 : vector<32x128xf32>
    %cst_5 = arith.constant 0.000000e+00 : f32
    %6 = vector.broadcast %cst_5 : f32 to vector<32x128xf32>
    %7 = arith.maximumf %5, %6 : vector<32x128xf32>
    %c0_6 = arith.constant 0 : index
    %c0_7 = arith.constant 0 : index
    %8 = vector.load %arg4[%c0_6, %c0_7] : memref<64x32xbf16, #tpu.memory_space<vmem>>, vector<64x32xbf16>
    %9 = arith.truncf %7 : vector<32x128xf32> to vector<32x128xbf16>
    %cst_8 = arith.constant dense<0.000000e+00> : vector<64x128xf32>
    %10 = tpu.matmul %8, %9, %cst_8 {dimension_numbers = #tpu.dot_dimension_numbers<[1], [0], [0], [1], [0, 0, 1, 1], [], []>} : vector<64x32xbf16>, vector<32x128xbf16>, vector<64x128xf32> -> vector<64x128xf32>
    %c0_9 = arith.constant 0 : index
    %c0_10 = arith.constant 0 : index
    %11 = vector.load %arg5[%c0_9, %c0_10] : memref<64x1xf32, #tpu.memory_space<vmem>>, vector<64x1xf32>
    %12 = vector.broadcast %11 : vector<64x1xf32> to vector<64x128xf32>
    %13 = arith.addf %10, %12 : vector<64x128xf32>
    %cst_11 = arith.constant 0.000000e+00 : f32
    %14 = vector.broadcast %cst_11 : f32 to vector<64x128xf32>
    %15 = arith.maximumf %13, %14 : vector<64x128xf32>
    %c0_12 = arith.constant 0 : index
    %c0_13 = arith.constant 0 : index
    %16 = vector.load %arg6[%c0_12, %c0_13] : memref<4x64xbf16, #tpu.memory_space<vmem>>, vector<4x64xbf16>
    %17 = arith.truncf %15 : vector<64x128xf32> to vector<64x128xbf16>
    %cst_14 = arith.constant dense<0.000000e+00> : vector<4x128xf32>
    %18 = tpu.matmul %16, %17, %cst_14 {dimension_numbers = #tpu.dot_dimension_numbers<[1], [0], [0], [1], [0, 0, 1, 1], [], []>} : vector<4x64xbf16>, vector<64x128xbf16>, vector<4x128xf32> -> vector<4x128xf32>
    %c0_15 = arith.constant 0 : index
    %c0_16 = arith.constant 0 : index
    %19 = vector.load %arg7[%c0_15, %c0_16] : memref<4x1xf32, #tpu.memory_space<vmem>>, vector<4x1xf32>
    %20 = vector.broadcast %19 : vector<4x1xf32> to vector<4x128xf32>
    %21 = arith.addf %18, %20 : vector<4x128xf32>
    %cst_17 = arith.constant dense<0xFF800000> : vector<128xf32>
    %22 = vector.multi_reduction <maximumf>, %21, %cst_17 [0] : vector<4x128xf32> to vector<128xf32>
    %23 = vector.shape_cast %22 : vector<128xf32> to vector<1x128xf32>
    %24 = vector.broadcast %23 : vector<1x128xf32> to vector<4x128xf32>
    %25 = arith.subf %21, %24 : vector<4x128xf32>
    %26 = math.exp %25 : vector<4x128xf32>
    %cst_18 = arith.constant dense<0.000000e+00> : vector<128xf32>
    %27 = vector.multi_reduction <add>, %26, %cst_18 [0] : vector<4x128xf32> to vector<128xf32>
    %28 = vector.shape_cast %27 : vector<128xf32> to vector<1x128xf32>
    %29 = tpu.reciprocal %28 {approx = true} : vector<1x128xf32> -> vector<1x128xf32>
    %30 = vector.broadcast %29 : vector<1x128xf32> to vector<4x128xf32>
    %31 = arith.mulf %26, %30 : vector<4x128xf32>
    %c0_19 = arith.constant 0 : index
    %c0_20 = arith.constant 0 : index
    %32 = vector.load %arg8[%c0_19, %c0_20] : memref<4x128xf32, #tpu.memory_space<vmem>>, vector<4x128xf32>
    tpu.vector_store %arg8[%c0_19, %c0_20], %31 {strides = array<i32>} : memref<4x128xf32, #tpu.memory_space<vmem>>, vector<4x128xf32>,
    return
  }
  func.func @transform_0(%arg0: i32) -> (i32, i32) {
    %c0_i32 = arith.constant 0 : i32
    %c0_i32_0 = arith.constant 0 : i32
    return %c0_i32, %arg0 : i32, i32
  }
  func.func @transform_1(%arg0: i32) -> (i32, i32) {
    %c0_i32 = arith.constant 0 : i32
    %c0_i32_0 = arith.constant 0 : i32
    %c0_i32_1 = arith.constant 0 : i32
    return %c0_i32, %c0_i32_0 : i32, i32
  }
  func.func @transform_2(%arg0: i32) -> (i32, i32) {
    %c0_i32 = arith.constant 0 : i32
    %c0_i32_0 = arith.constant 0 : i32
    %c0_i32_1 = arith.constant 0 : i32
    return %c0_i32, %c0_i32_0 : i32, i32
  }
  func.func @transform_3(%arg0: i32) -> (i32, i32) {
    %c0_i32 = arith.constant 0 : i32
    %c0_i32_0 = arith.constant 0 : i32
    %c0_i32_1 = arith.constant 0 : i32
    return %c0_i32, %c0_i32_0 : i32, i32
  }
  func.func @transform_4(%arg0: i32) -> (i32, i32) {
    %c0_i32 = arith.constant 0 : i32
    %c0_i32_0 = arith.constant 0 : i32
    %c0_i32_1 = arith.constant 0 : i32
    return %c0_i32, %c0_i32_0 : i32, i32
  }
  func.func @transform_5(%arg0: i32) -> (i32, i32) {
    %c0_i32 = arith.constant 0 : i32
    %c0_i32_0 = arith.constant 0 : i32
    %c0_i32_1 = arith.constant 0 : i32
    return %c0_i32, %c0_i32_0 : i32, i32
  }
  func.func @transform_6(%arg0: i32) -> (i32, i32) {
    %c0_i32 = arith.constant 0 : i32
    %c0_i32_0 = arith.constant 0 : i32
    %c0_i32_1 = arith.constant 0 : i32
    return %c0_i32, %c0_i32_0 : i32, i32
  }
  func.func @transform_7(%arg0: i32) -> (i32, i32) {
    %c0_i32 = arith.constant 0 : i32
    %c0_i32_0 = arith.constant 0 : i32
    return %c0_i32, %arg0 : i32, i32
  }
}

</mosaic_0001>

<bundles_post_ra>
// kernel: tpu_custom_call.1
= control target key start
LH: loop header
LB: loop body
LE: loop exit
PB: predicated region body
PF: predicated region fallthrough
CT: control target
= control target key end

     0   :  { %12 = vsyncpa [#allocation3], 0  ;;  %s1090_s0 = inlined_call_operand.vmem [shape: bf16[8,256], index: 0, kind: input, shape index: {}]   ;;  %s1091_s1 = inlined_call_operand.vmem [shape: bf16[32,8], index: 1, kind: input, shape index: {}]   ;;  %s1092_s2 = inlined_call_operand.vmem [shape: f32[32,1], index: 2, kind: input, shape index: {}]   ;;  %s1093_s3 = inlined_call_operand.vmem [shape: bf16[64,32], index: 3, kind: input, shape index: {}]   ;;  %s1094_s4 = inlined_call_operand.vmem [shape: f32[64,1], index: 4, kind: input, shape index: {}]   ;;  %s1095_s5 = inlined_call_operand.vmem [shape: bf16[4,64], index: 5, kind: input, shape index: {}]   ;;  %s1096_s6 = inlined_call_operand.vmem [shape: f32[4,1], index: 6, kind: input, shape index: {}]   ;;  %s1097_s7 = inlined_call_operand.hbm [shape: f32[4,256], index: 7, kind: output, shape index: {}]  }
   0x1   :  { %14 = vsyncpa [#allocation3 + $0x1], 0  ;;  %s920_s24 = smov 0   ;;  %s922_s25 = smov 0  }
   0x2   :  { %s924_s26 = smov 0   ;;  %s926_s27 = smov 0  }
   0x3 LB: > { %s941_s28 = sadd.s32 4294967295, %s874_s27   ;;  %s690_s29 = sadd.s32 4294967294, %s874_s27   ;;  %s874_s27 = sphi %s926_s27, %s1103_s27   ;;  %s870_s26 = sphi %s924_s26, %s1102_s26   ;;  %s866_s25 = sphi %s922_s25, %s1101_s25   ;;  %s862_s24 = sphi %s920_s24, %s1100_s24  }
   0x4   : > { %s945_s30 = sadd.s32 1, %s874_s27   ;;  %s179_s8 = sadd.s32 1, %s870_s26 }
   0x5   : > { %s176_s9 = ssub.s32 %s874_s27, %s945_s30  ;;  %p189_p0 = scmp.ne.s32.totalorder %s870_s26, %s866_s25 }
   0x6   : > { %p177_p1 = scmp.eq.s32.totalorder %s176_s9, 0  ;;  %p190_p2 = scmp.eq.s32.totalorder %s941_s28, 1 }
   0x7   : > { %p195_p3 = scmp.ne.s32.totalorder %s866_s25, %s862_s24  ;;  %p196_p4 = scmp.eq.s32.totalorder %s690_s29, 1 }
   0x8   : > { %s956_s10 = scalar_select %p177_p1, %s870_s26, %s179_s8  }
   0x9   : > { %p958_p5 = por %p190_p2, %p189_p0  ;;  %p962_p6 = por %p196_p4, %p195_p3 }
   0xa   : > { %p693_p7 = scmp.ge.s32.totalorder %s874_s27, 1  ;;  %p239_p8 = scmp.lt.s32.totalorder %s874_s27, 3 }
   0xc   : > { %p240_p9 = pnand %p693_p7, %p239_p8 }
   0xd   : > { %p270_p10 = scmp.lt.s32.totalorder (!%p240_p9), %s941_s28, 1  ;;  %v802_v0 = vld [vmem:[%s1091_s1] sm:$0xff] (!%p240_p9)   ;;  %vm314_vm0 = vcmask (!%p240_p9), 64512   ;;  %v876_v2 = vmov (!%p240_p9), 0   ;;  %v282_v3 = vld [vmem:[%s1092_s2 + $0x10] sm:$0xff] (!%p240_p9)  ;;  %vm321_vm1 = vcmask (!%p240_p9), 1043456  }
   0xe   : > { %243 = sbr.rel (%p240_p9) target bundleno = 777 (0x309), region = 48  ;;  %v280_v1 = vld [vmem:[%s1092_s2] sm:$0xff] (!%p240_p9)  ;;  %729 = vmatprep.mubr.msk.bf16.mxu0 (!%p240_p9), %vm314_vm0, %v802_v0  ;;  %800 = vset.pattern.permute.xlu0 (!%p240_p9), %v876_v2  ;;  %v281_v4 = vld [vmem:[%s1092_s2 + $0x8] sm:$0xff] (!%p240_p9)  ;;  %v283_v7 = vld [vmem:[%s1092_s2 + $0x18] sm:$0xff] (!%p240_p9)  ;;  %vm456_vm2 = vcmask (!%p240_p9), 261120   ;;  %v877_v40 = vmov (!%p240_p9), 0.0  }
   0xf   : > { %286 = vperm.xlu0 (!%p240_p9), %800, %v280_v1   ;;  %801 = vset.pattern.permute.xlu1 (!%p240_p9), %v876_v2  ;;  %v803_v6 = vld [vmem:[%s1091_s1 + $0x8] sm:$0xff] (!%p240_p9)   ;;  %v388_v9 = vld [vmem:[%s1094_s4] sm:$0xff] (!%p240_p9)  ;;  %v390_v11 = vld [vmem:[%s1094_s4 + $0x10] sm:$0xff] (!%p240_p9)  ;;  %vm878_vm3 = vmmov (!%p240_p9), 0   ;;  %vm553_vm4 = vcmask (!%p240_p9), 523264   ;;  %s710_s18 = sshll.u32 (!%p240_p9), %s941_s28, 6 }
  0x10   : > { %296 = vperm.xlu1 (!%p240_p9), %801, %v282_v3   ;;  %v389_v10 = vld [vmem:[%s1094_s4 + $0x8] sm:$0xff] (!%p240_p9)  ;;  %v391_v12 = vld [vmem:[%s1094_s4 + $0x18] sm:$0xff] (!%p240_p9)  ;;  %v392_v13 = vld [vmem:[%s1094_s4 + $0x20] sm:$0xff] (!%p240_p9) }
  0x11   : > { %v393_v14 = vld [vmem:[%s1094_s4 + $0x28] sm:$0xff] (!%p240_p9)  ;;  %v394_v15 = vld [vmem:[%s1094_s4 + $0x30] sm:$0xff] (!%p240_p9)  ;;  %v395_v16 = vld [vmem:[%s1094_s4 + $0x38] sm:$0xff] (!%p240_p9) }
  0x12   : > { %v547_v17 = vld [vmem:[%s1096_s6] sm:$0xf] (!%p240_p9)  ;;  %v805_v37 = vld [vmem:[%s1093_s3 + $0x8] sm:$0xff] (!%p240_p9)   ;;  %v806_v38 = vld [vmem:[%s1093_s3 + $0x10] sm:$0xff] (!%p240_p9)  }
  0x13   : > { %291 = vperm.xlu0 (!%p240_p9), %800, %v281_v4   ;;  %v804_v18 = vld [vmem:[%s1093_s3] sm:$0xff] (!%p240_p9)   ;;  %v807_v39 = vld [vmem:[%s1093_s3 + $0x18] sm:$0xff] (!%p240_p9)  }
  0x14   : > { %301 = vperm.xlu1 (!%p240_p9), %801, %v283_v7   ;;  %737 = vmatprep.mubr.msk.bf16.mxu1 (!%p240_p9), %vm456_vm2, %v804_v18 }
  0x15   : > { %s271_s15 = scalar_select %p270_p10, %s941_s28, 1 }
  0x16   : > { %s879_s28 = smov [#allocation2]  }
  0x17   : > { %s695_s20 = sshll.u32 %s271_s15, 2  ;;  %398 = vperm.xlu0 %800, %v388_v9   ;;  %s267_s15 = sand.u32 1, %s866_s25  }
  0x18   : > { %s273_s23 = scalar_lea.vmem %s1090_s0, %s695_s20  ;;  %403 = vperm.xlu1 %801, %v389_v10   ;;  %s694_s17 = sshll.u32 %s267_s15, 2 }
  0x19   : > { %v275_v5 = vld [vmem:[%s273_s23] sm:$0xf]  ;;  %s269_s19 = scalar_lea.vmem [#allocation2], %s694_s17  ;;  %s1048_s23 = scalar_lea.hbm %s1097_s7, %s710_s18 }
  0x1a   : > { %757 = vmatprep.subr.msk.bf16.mxu0 %vm321_vm1, %v275_v5  ;;  %v323_v8 = vsel %vm321_vm1, %v275_v5, 0  ;;  %s631_s20 = sshll.u32 %s269_s19, 4  ;;  %s618_s29 = scalar_lea.sflag [#allocation3], %s267_s15  ;;  %s1050_s20 = int_to_ptr.vmem [resolvable:$true] %s631_s20 }
  0x1b   : > { %728 = vmatpush3.bf16.msra.mxu0 %v323_v8  ;;  %408 = vperm.xlu0 %800, %v390_v11   ;;  %s812_s8 = scalar_lea.vmem %s1050_s20, 64  ;;  %s816_s9 = sshll.u32 %s879_s28, 4  ;;  %s817_s9 = int_to_ptr.vmem [resolvable:$false] %s816_s9 }
  0x1c   : > { %413 = vperm.xlu1 %801, %v391_v12   ;;  %745 = vmatprep.subr.bf16.mxu0 %v877_v40  ;;  %p813_p11 = scmp.ne.s32.totalorder %s1050_s20, %s812_s8  ;;  %s818_s13 = scalar_lea.vmem %s817_s9, 128 }
  0x1d   : > { %p819_p0 = scmp.lt.s32.totalorder %s1050_s20, %s817_s9  ;;  %p820_p1 = scmp.lt.s32.totalorder %s818_s13, %s812_s8 }
  0x1e   : > { %730 = vmatmul.mubr.msk.bf16.vlgmr.msra.gmra.mrb[0].mxu0 %vm314_vm0, %v803_v6  ;;  %p814_p12 = pnand %p813_p11, %p958_p5 }
  0x1f   : > { %418 = vperm.xlu0 %800, %v392_v13   ;;  %753 = vmatprep.mubr.msk.bf16.mxu0 %vm878_vm3, %v877_v40  ;;  %v542_v13 = vld [vmem:[%s1095_s5] sm:$0x3]  ;;  %p821_p2 = por %p820_p1, %p819_p0 }
  0x20   : > { %423 = vperm.xlu1 %801, %v393_v14   ;;  %p815_p13 = pneg %p814_p12 }
  0x22   : > { %p822_p3 = pnand %p821_p2, %p815_p13 }
  0x23   : > { %428 = vperm.xlu0 %800, %v394_v15  }
  0x24   : > { %433 = vperm.xlu1 %801, %v395_v16  }
  0x27   : > { %550 = vperm.xlu0 %800, %v547_v17  }
  0x8e   : > { %v287_v20 = vpop.permute.xlu0 %286 }
  0x8f   : > { %v297_v19 = vpop.permute.xlu1 %296 }
  0x92   : > { %v292_v27 = vpop.permute.xlu0 %291 }
  0x93   : > { %v302_v24 = vpop.permute.xlu1 %301 }
  0x96   : > { %v399_v41 = vpop.permute.xlu0 %398 }
  0x97   : > { %v404_v42 = vpop.permute.xlu1 %403 }
  0x9a   : > { %v409_v43 = vpop.permute.xlu0 %408 }
  0x9b   : > { %v414_v44 = vpop.permute.xlu1 %413 }
  0x9e   : > { %v419_v48 = vpop.permute.xlu0 %418 }
  0x9f   : > { %v424_v53 = vpop.permute.xlu1 %423 }
  0xa2   : > { %v429_v60 = vpop.permute.xlu0 %428 }
  0xa3   : > { %v434_v1 = vpop.permute.xlu1 %433 }
  0xa6   : > { %v551_v14 = vpop.permute.xlu0 %550 }
  0xf1   : > { %v731_v21 = vpop.f32.mrb[0].mxu0 }
  0xf2   : > { %v368_v22 = vadd.f32 %v731_v21, %v297_v19  ;;  %v359_v23 = vpop.f32.mrb[1].mxu0 }
  0xf3   : > { %v360_v25 = vadd.f32 %v359_v23, %v287_v20  ;;  %v732_v26 = vpop.f32.mrb[2].mxu0 }
  0xf4   : > { %v371_v28 = vadd.f32 %v732_v26, %v302_v24  ;;  %v362_v29 = vpop.f32.mrb[3].mxu0  ;;  %v376_v31 = vmax.f32 %v368_v22, 0.0 }
  0xf5   : > { %v363_v30 = vadd.f32 %v362_v29, %v292_v27  ;;  %v374_v33 = vmax.f32 %v360_v25, 0.0 }
  0xf6   : > { %v377_v32 = vmax.f32 %v371_v28, 0.0 }
  0xf7   : > { %v375_v34 = vmax.f32 %v363_v30, 0.0 }
  0xf8   : > { %v387_v35 = vpack.c.bf16 %v377_v32, %v376_v31 }
  0xf9   : > { %v386_v36 = vpack.c.bf16 %v375_v34, %v374_v33 }
  0xfb   : > { %733 = vmatprep.subr.bf16.mxu1 %v386_v36 }
  0xfc   : > { %734 = vmatpush3.bf16.msra.mxu1 %v386_v36 }
  0xfd   : > { %735 = vmatprep.subr.bf16.mxu1 %v387_v35 }
 0x100   : > { %736 = vmatpush3.bf16.msra.mxu1 %v387_v35 }
 0x103   : > { %738 = vmatmul.mubr.msk.bf16.vlgmr.msra.gmra.mrb[0].mxu1 %vm456_vm2, %v805_v37 }
 0x104   : > { %741 = vmatprep.mubr.msk.bf16.mxu1 %vm456_vm2, %v806_v38 }
 0x10b   : > { %742 = vmatmul.mubr.msk.bf16.gmra.mrb[4].mxu1 %vm456_vm2, %v807_v39 }
 0x1d6   : > { %v739_v45 = vpop.f32.mrb[0].mxu1 }
 0x1d7   : > { %v512_v46 = vadd.f32 %v739_v45, %v409_v43  ;;  %v503_v47 = vpop.f32.mrb[1].mxu1 }
 0x1d8   : > { %v504_v49 = vadd.f32 %v503_v47, %v399_v41  ;;  %v740_v50 = vpop.f32.mrb[2].mxu1 }
 0x1d9   : > { %v515_v51 = vadd.f32 %v740_v50, %v414_v44  ;;  %v506_v52 = vpop.f32.mrb[3].mxu1  ;;  %v536_v55 = vmax.f32 %v512_v46, 0.0 }
 0x1da   : > { %v507_v54 = vadd.f32 %v506_v52, %v404_v42  ;;  %v534_v57 = vmax.f32 %v504_v49, 0.0 }
 0x1db   : > { %v537_v56 = vmax.f32 %v515_v51, 0.0 }
 0x1dc   : > { %v535_v58 = vmax.f32 %v507_v54, 0.0 }
 0x1dd   : > { %v544_v59 = vpack.c.bf16 %v537_v56, %v536_v55 }
 0x1de   : > { %v543_v61 = vpack.c.bf16 %v535_v58, %v534_v57  ;;  %v743_v62 = vpop.f32.mrb[4].mxu1 }
 0x1df   : > { %v528_v63 = vadd.f32 %v743_v62, %v429_v60  ;;  %v519_v0 = vpop.f32.mrb[5].mxu1 }
 0x1e0   : > { %v520_v2 = vadd.f32 %v519_v0, %v419_v48  ;;  %v744_v3 = vpop.f32.mrb[6].mxu1  ;;  %746 = vmatpush3.bf16.msra.mxu0 %v543_v61 }
 0x1e1   : > { %v531_v4 = vadd.f32 %v744_v3, %v434_v1  ;;  %v522_v5 = vpop.f32.mrb[7].mxu1  ;;  %747 = vmatprep.subr.bf16.mxu0 %v877_v40  ;;  %v540_v7 = vmax.f32 %v528_v63, 0.0 }
 0x1e2   : > { %v523_v6 = vadd.f32 %v522_v5, %v424_v53  ;;  %v538_v9 = vmax.f32 %v520_v2, 0.0 }
 0x1e3   : > { %v541_v8 = vmax.f32 %v531_v4, 0.0 }
 0x1e4   : > { %v539_v10 = vmax.f32 %v523_v6, 0.0  ;;  %748 = vmatpush3.bf16.msra.mxu0 %v544_v59 }
 0x1e5   : > { %v546_v11 = vpack.c.bf16 %v541_v8, %v540_v7  ;;  %749 = vmatprep.subr.bf16.mxu0 %v877_v40 }
 0x1e6   : > { %v545_v12 = vpack.c.bf16 %v539_v10, %v538_v9 }
 0x1e8   : > { %750 = vmatpush3.bf16.msra.mxu0 %v545_v12 }
 0x1e9   : > { %751 = vmatprep.subr.bf16.mxu0 %v877_v40 }
 0x1ec   : > { %752 = vmatpush3.bf16.msra.mxu0 %v546_v11 }
 0x1ef   : > { %754 = vmatmul.mubr.msk.bf16.vlgmr.msra.gmra.mrb[4].mxu0 %vm553_vm4, %v542_v13 }
 0x2c2   : > { %v591_v15 = vpop.f32.mrb[4].mxu0 }
 0x2c3   : > { %v592_v16 = vadd.f32 %v591_v15, %v551_v14  ;;  %v755_v17 = vpop.f32.mrb[5].mxu0 }
 0x2c4   : > { %v594_v18 = vpop.f32.mrb[6].mxu0 }
 0x2c5   : > { %v597_v19 = vsel %vm321_vm1, %v592_v16, -inf  ;;  %v756_v20 = vpop.f32.mrb[7].mxu0 }
 0x2c6   : > { %v598_v21 = vrot.slane %v597_v19, 4 }
 0x2c8   : > { %v599_v22 = vmax.f32 %v597_v19, %v598_v21 }
 0x2ca   : > { %v600_v23 = vrot.slane %v599_v22, 2 }
 0x2cc   : > { %v601_v24 = vmax.f32 %v599_v22, %v600_v23 }
 0x2ce   : > { %v602_v25 = vrot.slane %v601_v24, 1 }
 0x2d0   : > { %v603_v26 = vmax.f32 %v601_v24, %v602_v25 }
 0x2d2   : > { %v604_v27 = vsub.f32 %v592_v16, %v603_v26 }
 0x2d4   : > { %v605_v28 = vmul.f32 1.442695, %v604_v27 }
 0x2d6   : > { %808 = vpow2.f32 %v605_v28 }
 0x2e0   : > { %v809_v29 = vpop.eup %808 }
 0x2e1   : > { %v607_v30 = vsel %vm321_vm1, %v809_v29, 0.0 }
 0x2e2   : > { %v608_v31 = vrot.slane %v607_v30, 4 }
 0x2e4   : > { %v609_v32 = vadd.f32 %v608_v31, %v607_v30 }
 0x2e6   : > { %v610_v33 = vrot.slane %v609_v32, 2 }
 0x2e8   : > { %v611_v34 = vadd.f32 %v610_v33, %v609_v32 }
 0x2ea   : > { %v612_v35 = vrot.slane %v611_v34, 1 }
 0x2ec   : > { %v613_v36 = vadd.f32 %v612_v35, %v611_v34 }
 0x2ee   : > { %810 = vrcp.f32 %v613_v36 }
 0x2f8   : > { %v811_v37 = vpop.eup %810 }
 0x2f9   : > { %v615_v38 = vmul.f32 %v811_v37, %v809_v29 }
 0x2fb   : > { %616 = vst [vmem:[%s269_s19] sm:$0xf] %v615_v38 }
 0x2fc   : > { %825 = shalt.err (!%p822_p3)
}
 0x2fd   : > { %s826_s14 = scalar_lea.hbm %s1048_s23, 64  ;;  %s830_s17 = scalar_lea.hbm %s1097_s7, 128 }
 0x2fe   : > { %p827_p4 = scmp.ne.s32.totalorder %s1048_s23, %s826_s14  ;;  %p831_p9 = scmp.lt.u32.totalorder %s1048_s23, %s1097_s7 }
 0x2ff   : > { %p832_p10 = scmp.lt.u32.totalorder %s830_s17, %s826_s14  ;;  %p834_p12 = scmp.lt.u32.totalorder %s826_s14, %s1048_s23 }
 0x300   : > { %p828_p7 = pnand %p827_p4, %p958_p5 }
 0x301   : > { %p833_p11 = por %p832_p10, %p831_p9 }
 0x302   : > { %p829_p8 = pneg %p828_p7 }
 0x303   : > { %p835_p13 = por %p834_p12, %p833_p11 }
 0x305   : > { %p836_p0 = pnand %p835_p13, %p829_p8 }
 0x307   : > { %839 = shalt.err (!%p836_p0)
}
 0x308   : > { %758 = dma.vmem_to_hbm [thread:$0]  (%p958_p5), %s1050_s20, 64, %s1048_s23, %s618_s29  }
 0x309 PF: > { %p764_p1 = scmp.ge.s32.totalorder %s874_s27, 2  ;;  %s643_s21 = sand.u32 1, %s862_s24  }
 0x30a   : > { %s644_s22 = scalar_lea.sflag [#allocation3], %s643_s21 }
 0x30b   : > { %p761_p2 = pnand %p764_p1, %p962_p6 }
 0x30d   : > { %857 = dma.done.wait (!%p761_p2), %s644_s22, 64  }
 0x30e   : > { %859 = vsyncadd (!%p761_p2), %s644_s22, 4294967232  ;;  %p17_p3 = scmp.ge.s32.totalorder %s945_s30, 4   ;;  %s1100_s24 = smov %s866_s25 }
 0x30f   : > { %s1101_s25 = smov %s870_s26  ;;  %s1102_s26 = smov %s956_s10 }
 0x310   : > { %s1103_s27 = smov %s945_s30  ;;  %19 = sbr.rel (!%p17_p3) target bundleno = 3 (0x3), region = 83 }
 0x317   :  { %649 = vsyncpa [#allocation3], 1 }
 0x318   :  { %651 = vsyncpa [#allocation3 + $0x1], 1 }

</bundles_post_ra>
